<compile_context>
chip_gen: v6e
topology: v6e:2x2x1
jax: 0.10.0
libtpu: 0.0.40
codegen_flags: <defaults>
</compile_context>

<pallas_src>
import functools

import jax
import jax.numpy as jnp
from jax.experimental import pallas as pl
from jax.experimental.pallas import tpu as pltpu


_NEG_BIG = -1e30     # plain Python float (never captured as a traced constant)
_LANES = 128         # lane width for the partial-loss output tile
_OUT_SUB = 8         # sublane rows of the partial-loss output tile


def _round_up(n, m):
    return ((n + m - 1) // m) * m


def _pick_tb(b):
    """Batch-tile size: ~512 rows for big batches, >=2 tiles when possible
    (v7x has 2 TensorCores), never pad a tiny batch up to a huge tile."""
    if b <= 256:
        return max(8, _round_up(b, 8))
    if b <= 1024:
        return _round_up((b + 1) // 2, 8)   # split into 2 tiles
    return 512


def _resident_spec(shape, index_map):
    """BlockSpec for a grid-invariant (resident) operand: single-buffered."""
    if hasattr(pl, "Buffered"):
        try:
            return pl.BlockSpec(shape, index_map, pipeline_mode=pl.Buffered(1))
        except TypeError:
            pass
    return pl.BlockSpec(shape, index_map)


def prepare_params(w, b):
    """One-time (hoisted out of the per-call path) param prep.

    w: (C, D) f32 in PyTorch nn.Linear layout, b: (C,) f32.
    Returns W^T padded/cast to (D_pad, C_pad) bf16 and bias padded to
    (1, C_pad) f32 with the padded class columns at -1e30, which folds the
    padded-class mask into the bias add inside the kernel.
    """
    C, D = w.shape
    d_pad = _round_up(D, 128)
    # v6e MXU is 2x256^2: fill the array width once C exceeds one lane group.
    c_pad = _LANES if C <= _LANES else _round_up(C, 256)
    w_t = jnp.zeros((d_pad, c_pad), jnp.bfloat16).at[:D, :C].set(
        w.T.astype(jnp.bfloat16))
    b_p = jnp.full((1, c_pad), _NEG_BIG, jnp.float32).at[0, :C].set(
        b.astype(jnp.float32))
    return w_t, b_p


def ce_linear_kernel(x_ref, w_ref, b_ref, y_ref, loss_ref, *, b_valid):
    tile = pl.program_id(0)

    # In-kernel f32 -> bf16 cast (VPU, hidden under the DMA), bf16 MXU matmul
    # with f32 accumulation, f32 bias add.  Padded class columns arrive at
    # -1e30 through the bias, so no explicit class mask is needed.
    x_bf16 = x_ref[...].astype(jnp.bfloat16)
    logits = jnp.dot(x_bf16, w_ref[...], preferred_element_type=jnp.float32)
    logits = logits + b_ref[...]                                  # (TB, C_pad) f32

    tb, c_pad = logits.shape

    # Numerically-stable log-sum-exp per row (all f32).
    m = jnp.max(logits, axis=-1, keepdims=True)                              # (TB, 1)
    lse = m + jnp.log(jnp.sum(jnp.exp(logits - m), axis=-1, keepdims=True))  # (TB, 1)

    # Logit of the true class via select (no gather, no one-hot matmul).
    # Assumes labels in [0, C); ignore_index-style labels are not supported.
    class_ids = jax.lax.broadcasted_iota(jnp.int32, (tb, c_pad), 1)
    correct = jnp.sum(
        jnp.where(class_ids == y_ref[...], logits, 0.0), axis=-1, keepdims=True
    )                                                                        # (TB, 1)

    per_example = lse - correct                                              # (TB, 1)

    # Mask padded batch rows out of the sum.
    row_ids = tile * tb + jax.lax.broadcasted_iota(jnp.int32, (tb, 1), 0)
    per_example = jnp.where(row_ids < b_valid, per_example, 0.0)

    partial = jnp.sum(per_example)                                           # scalar

    # Lane-dense (8,128) output tile: partial sum at [0,0], zeros elsewhere.
    lane = jax.lax.broadcasted_iota(jnp.int32, (_OUT_SUB, _LANES), 1)
    sub = jax.lax.broadcasted_iota(jnp.int32, (_OUT_SUB, _LANES), 0)
    loss_ref[...] = jnp.where((lane == 0) & (sub == 0), partial, 0.0)


def linear_ce_loss(x, y, w_t, b_p):
    """Mean cross-entropy of a linear layer.

    x: (B, D) f32, y: (B,) int32 labels, (w_t, b_p) from prepare_params().
    Returns scalar f32 loss.
    """
    B, D = x.shape
    d_pad, c_pad = w_t.shape

    tb = _pick_tb(B)
    b_pad = _round_up(B, tb)
    num_tiles = b_pad // tb

    # x stays f32 (cast happens in-kernel); pad only when actually needed.
    if (b_pad, d_pad) != (B, D):
        x_p = jnp.zeros((b_pad, d_pad), jnp.float32).at[:B, :D].set(
            x.astype(jnp.float32))
    else:
        x_p = x.astype(jnp.float32)

    if b_pad != B:
        y_p = jnp.zeros((b_pad, 1), jnp.int32).at[:B, 0].set(y.astype(jnp.int32))
    else:
        y_p = y.astype(jnp.int32).reshape(B, 1)

    kernel = functools.partial(ce_linear_kernel, b_valid=B)  # Python int, no capture

    # Explicit VMEM budget with headroom (x f32 double-buffered, W/bias
    # single-buffered, labels double-buffered, output double-buffered).
    vmem_need = (2 * tb * d_pad * 4
                 + d_pad * c_pad * 2
                 + c_pad * 4
                 + 2 * tb * 4
                 + 2 * _OUT_SUB * _LANES * 4)
    vmem_limit = min(max(2 * vmem_need, 8 << 20), 48 << 20)

    partials = pl.pallas_call(
        kernel,
        out_shape=jax.ShapeDtypeStruct((num_tiles * _OUT_SUB, _LANES), jnp.float32),
        grid_spec=pltpu.PrefetchScalarGridSpec(
            num_scalar_prefetch=0,
            grid=(num_tiles,),
            in_specs=[
                pl.BlockSpec((tb, d_pad), lambda i: (i, 0)),        # x tile (f32)
                _resident_spec((d_pad, c_pad), lambda i: (0, 0)),   # W (resident)
                _resident_spec((1, c_pad), lambda i: (0, 0)),       # bias (resident)
                pl.BlockSpec((tb, 1), lambda i: (i, 0)),            # labels
            ],
            out_specs=pl.BlockSpec((_OUT_SUB, _LANES), lambda i: (i, 0)),
        ),
        compiler_params=pltpu.CompilerParams(
            dimension_semantics=("parallel",),
            vmem_limit_bytes=vmem_limit,
        ),
    )(x_p, w_t, b_p, y_p)

    return jnp.sum(partials) / jnp.float32(B)


if __name__ == "__main__":
    # Small, module-consistent shapes: batch=8, input_dim=32, output_dim=16.
    B, D, C = 8, 32, 16
    weight_scale = 0.1

    key = jax.random.PRNGKey(0)
    kx, kw, ky = jax.random.split(key, 3)

    x = jax.random.normal(kx, (B, D), dtype=jnp.float32)
    # reset(weight_scale): weight ~ N(0, weight_scale), bias = 0
    w = weight_scale * jax.random.normal(kw, (C, D), dtype=jnp.float32)  # (out, in)
    b = jnp.zeros((C,), dtype=jnp.float32)
    y = jax.random.randint(ky, (B,), 0, C, dtype=jnp.int32)

    w_t, b_p = prepare_params(w, b)        # one-time weight prep (hoisted)
    loss = linear_ce_loss(x, y, w_t, b_p)
    jax.block_until_ready(loss)

    # Sanity check vs. pure-JAX reference (same bf16 matmul / f32 accumulation).
    logits_ref = jnp.dot(
        x.astype(jnp.bfloat16), w.T.astype(jnp.bfloat16),
        preferred_element_type=jnp.float32) + b[None, :]
    ref = jnp.mean(
        jax.nn.logsumexp(logits_ref, axis=-1)
        - jnp.take_along_axis(logits_ref, y[:, None], axis=-1)[:, 0]
    )
    assert jnp.allclose(loss, ref, atol=1e-4, rtol=1e-4), (loss, ref)

    print("KERNEL_OK")
</pallas_src>

<mosaic_0001>
module attributes {stable_mosaic.version = 11 : i64} {
  func.func @ce_linear_kernel(%arg0: i32, %arg1: memref<8x128xf32, #tpu.memory_space<vmem>>, %arg2: memref<128x128xbf16, #tpu.memory_space<vmem>>, %arg3: memref<1x128xf32, #tpu.memory_space<vmem>>, %arg4: memref<8x1xi32, #tpu.memory_space<vmem>>, %arg5: memref<8x128xf32, #tpu.memory_space<vmem>>) attributes {dimension_semantics = [#tpu.dimension_semantics<parallel>], iteration_bounds = array<i64: 1>, scalar_prefetch = 0 : i64, scratch_operands = 0 : i64, tpu.core_type = #tpu.core_type<tc>, window_params = [{transform_indices = @transform_0, window_bounds = array<i64: 8, 128>}, {pipeline_mode = #tpu.pipeline_mode<synchronous>, transform_indices = @transform_1, window_bounds = array<i64: 128, 128>}, {pipeline_mode = #tpu.pipeline_mode<synchronous>, transform_indices = @transform_2, window_bounds = array<i64: 1, 128>}, {transform_indices = @transform_3, window_bounds = array<i64: 8, 1>}, {transform_indices = @transform_4, window_bounds = array<i64: 8, 128>}]} {
    %c0 = arith.constant 0 : index
    %c0_0 = arith.constant 0 : index
    %0 = vector.load %arg1[%c0, %c0_0] : memref<8x128xf32, #tpu.memory_space<vmem>>, vector<8x128xf32>
    %1 = arith.truncf %0 : vector<8x128xf32> to vector<8x128xbf16>
    %c0_1 = arith.constant 0 : index
    %c0_2 = arith.constant 0 : index
    %2 = vector.load %arg2[%c0_1, %c0_2] : memref<128x128xbf16, #tpu.memory_space<vmem>>, vector<128x128xbf16>
    %cst = arith.constant dense<0.000000e+00> : vector<8x128xf32>
    %3 = tpu.matmul %1, %2, %cst {dimension_numbers = #tpu.dot_dimension_numbers<[1], [0], [0], [1], [0, 0, 1, 1], [], []>} : vector<8x128xbf16>, vector<128x128xbf16>, vector<8x128xf32> -> vector<8x128xf32>
    %c0_3 = arith.constant 0 : index
    %c0_4 = arith.constant 0 : index
    %4 = vector.load %arg3[%c0_3, %c0_4] : memref<1x128xf32, #tpu.memory_space<vmem>>, vector<1x128xf32>
    %5 = vector.broadcast %4 : vector<1x128xf32> to vector<8x128xf32>
    %6 = arith.addf %3, %5 : vector<8x128xf32>
    %cst_5 = arith.constant dense<0xFF800000> : vector<8xf32>
    %7 = vector.multi_reduction <maximumf>, %6, %cst_5 [1] : vector<8x128xf32> to vector<8xf32>
    %8 = vector.shape_cast %7 : vector<8xf32> to vector<8x1xf32>
    %9 = vector.broadcast %8 : vector<8x1xf32> to vector<8x128xf32>
    %10 = arith.subf %6, %9 : vector<8x128xf32>
    %11 = math.exp %10 : vector<8x128xf32>
    %cst_6 = arith.constant dense<0.000000e+00> : vector<8xf32>
    %12 = vector.multi_reduction <add>, %11, %cst_6 [1] : vector<8x128xf32> to vector<8xf32>
    %13 = vector.shape_cast %12 : vector<8xf32> to vector<8x1xf32>
    %14 = math.log %13 : vector<8x1xf32>
    %15 = arith.addf %8, %14 : vector<8x1xf32>
    %16 = tpu.iota {dimensions = array<i32: 1>} : vector<8x128xi32>
    %c0_7 = arith.constant 0 : index
    %c0_8 = arith.constant 0 : index
    %17 = vector.load %arg4[%c0_7, %c0_8] : memref<8x1xi32, #tpu.memory_space<vmem>>, vector<8x1xi32>
    %18 = vector.broadcast %17 : vector<8x1xi32> to vector<8x128xi32>
    %19 = arith.cmpi eq, %16, %18 : vector<8x128xi32>
    %cst_9 = arith.constant 0.000000e+00 : f32
    %20 = vector.broadcast %cst_9 : f32 to vector<8x128xf32>
    %21 = arith.select %19, %6, %20 : vector<8x128xi1>, vector<8x128xf32>
    %cst_10 = arith.constant dense<0.000000e+00> : vector<8xf32>
    %22 = vector.multi_reduction <add>, %21, %cst_10 [1] : vector<8x128xf32> to vector<8xf32>
    %23 = vector.shape_cast %22 : vector<8xf32> to vector<8x1xf32>
    %24 = arith.subf %15, %23 : vector<8x1xf32>
    %c8_i32 = arith.constant 8 : i32
    %25 = arith.muli %arg0, %c8_i32 : i32
    %26 = tpu.iota {dimensions = array<i32: 0>} : vector<8x1xi32>
    %27 = vector.broadcast %25 : i32 to vector<8x1xi32>
    %28 = arith.addi %27, %26 : vector<8x1xi32>
    %c8_i32_11 = arith.constant 8 : i32
    %29 = vector.broadcast %c8_i32_11 : i32 to vector<8x1xi32>
    %30 = arith.cmpi slt, %28, %29 : vector<8x1xi32>
    %cst_12 = arith.constant 0.000000e+00 : f32
    %31 = vector.broadcast %cst_12 : f32 to vector<8x1xf32>
    %32 = arith.select %30, %24, %31 : vector<8x1xi1>, vector<8x1xf32>
    %33 = vector.shape_cast %32 : vector<8x1xf32> to vector<1x8x1xf32>
    %cst_13 = arith.constant dense<0.000000e+00> : vector<1xf32>
    %34 = vector.multi_reduction <add>, %33, %cst_13 [1, 2] : vector<1x8x1xf32> to vector<1xf32>
    %35 = vector.shape_cast %34 : vector<1xf32> to vector<1x1x1xf32>
    %36 = vector.extract %35[0, 0, 0] : f32 from vector<1x1x1xf32>
    %37 = tpu.iota {dimensions = array<i32: 1>} : vector<8x128xi32>
    %38 = tpu.iota {dimensions = array<i32: 0>} : vector<8x128xi32>
    %c0_i32 = arith.constant 0 : i32
    %39 = vector.broadcast %c0_i32 : i32 to vector<8x128xi32>
    %40 = arith.cmpi eq, %37, %39 : vector<8x128xi32>
    %c0_i32_14 = arith.constant 0 : i32
    %41 = vector.broadcast %c0_i32_14 : i32 to vector<8x128xi32>
    %42 = arith.cmpi eq, %38, %41 : vector<8x128xi32>
    %43 = arith.andi %40, %42 : vector<8x128xi1>
    %cst_15 = arith.constant 0.000000e+00 : f32
    %44 = vector.broadcast %36 : f32 to vector<8x128xf32>
    %45 = vector.broadcast %cst_15 : f32 to vector<8x128xf32>
    %46 = arith.select %43, %44, %45 : vector<8x128xi1>, vector<8x128xf32>
    %c0_16 = arith.constant 0 : index
    %c0_17 = arith.constant 0 : index
    %47 = vector.load %arg5[%c0_16, %c0_17] : memref<8x128xf32, #tpu.memory_space<vmem>>, vector<8x128xf32>
    tpu.vector_store %arg5[%c0_16, %c0_17], %46 {strides = array<i32>} : memref<8x128xf32, #tpu.memory_space<vmem>>, vector<8x128xf32>,
    return
  }
  func.func @transform_0(%arg0: i32) -> (i32, i32) {
    %c0_i32 = arith.constant 0 : i32
    %c0_i32_0 = arith.constant 0 : i32
    return %arg0, %c0_i32 : i32, i32
  }
  func.func @transform_1(%arg0: i32) -> (i32, i32) {
    %c0_i32 = arith.constant 0 : i32
    %c0_i32_0 = arith.constant 0 : i32
    %c0_i32_1 = arith.constant 0 : i32
    return %c0_i32, %c0_i32_0 : i32, i32
  }
  func.func @transform_2(%arg0: i32) -> (i32, i32) {
    %c0_i32 = arith.constant 0 : i32
    %c0_i32_0 = arith.constant 0 : i32
    %c0_i32_1 = arith.constant 0 : i32
    return %c0_i32, %c0_i32_0 : i32, i32
  }
  func.func @transform_3(%arg0: i32) -> (i32, i32) {
    %c0_i32 = arith.constant 0 : i32
    %c0_i32_0 = arith.constant 0 : i32
    return %arg0, %c0_i32 : i32, i32
  }
  func.func @transform_4(%arg0: i32) -> (i32, i32) {
    %c0_i32 = arith.constant 0 : i32
    %c0_i32_0 = arith.constant 0 : i32
    return %arg0, %c0_i32 : i32, i32
  }
}

</mosaic_0001>

<bundles_post_ra>
// kernel: tpu_custom_call.1
= control target key start
LH: loop header
LB: loop body
LE: loop exit
PB: predicated region body
PF: predicated region fallthrough
CT: control target
= control target key end

     0   :  { %9 = vsyncpa [#allocation3], 0  ;;  %s357_s0 = inlined_call_operand.vmem [shape: f32[8,128], index: 0, kind: input, shape index: {}]   ;;  %s358_s1 = inlined_call_operand.hbm [shape: bf16[128,128], index: 1, kind: input, shape index: {}]   ;;  %s359_s2 = inlined_call_operand.vmem [shape: f32[1,128], index: 2, kind: input, shape index: {}]   ;;  %s360_s3 = inlined_call_operand.vmem [shape: s32[8,1], index: 3, kind: input, shape index: {}]   ;;  %s361_s4 = inlined_call_operand.hbm [shape: f32[8,128], index: 4, kind: output, shape index: {}]  }
   0x1   :  { %10 = vsyncpa [#allocation4], 0  ;;  %s310_s15 = smov [#allocation2]  }
   0x2   :  { %s18_s16 = sshll.u32 %s310_s15, 4  ;;  %s19_s16 = int_to_ptr.vmem [resolvable:$true] %s18_s16 }
   0x3   :  { %s274_s17 = scalar_lea.vmem %s19_s16, 1024  ;;  %p279_p1 = scmp.lt.s32.totalorder %s19_s16, %s19_s16 }
   0x4   :  { %p275_p0 = scmp.ne.s32.totalorder %s19_s16, %s274_s17  ;;  %p280_p2 = scmp.lt.s32.totalorder %s274_s17, %s274_s17 }
   0x6   :  { %p281_p3 = por %p280_p2, %p279_p1 }
   0x8   :  { %p282_p4 = pnand %p281_p3, %p275_p0 }
   0xa   :  { %285 = shalt.err (!%p282_p4)
}
   0xb   :  { %s311_s18 = smov 64   ;;  %s312_s19 = smov 4  }
   0xc   :  { %24 = dma.hbm_to_vmem [thread:$0]  %s358_s1, 1024, %s19_s16, [#allocation3], %s311_s18, %s311_s18, %s312_s19  }
   0xd   :  { %306 = dma.done.wait [#allocation3], 1024  }
   0xe   :  { %307 = vsyncadd [#allocation3], 4294966272  ;;  %v313_v0 = vmov 0.0   ;;  %vm314_vm0 = vmmov 0   ;;  %v254_v1 = vld [vmem:[#allocation2 + $0x38] sm:$0xff]   ;;  %v255_v2 = vld [vmem:[#allocation2 + $0x30] sm:$0xff]   ;;  %v156_v22 = vlaneseq }
   0xf   :  { %224 = vmatprep.subr.bf16.mxu0 %v313_v0  ;;  %240 = vmatprep.mubr.msk.bf16.mxu0 %vm314_vm0, %v313_v0  ;;  %v256_v3 = vld [vmem:[#allocation2 + $0x28] sm:$0xff]   ;;  %v257_v4 = vld [vmem:[#allocation2 + $0x20] sm:$0xff]   ;;  %v258_v5 = vld [vmem:[#allocation2 + $0x18] sm:$0xff]   ;;  %v315_v11 = vmov 0   ;;  %vm174_vm2 = vcmask 7168  }
  0x10   :  { %225 = vmatpush3.bf16.msra.mxu0 %v254_v1  ;;  %v259_v6 = vld [vmem:[#allocation2 + $0x10] sm:$0xff]   ;;  %v260_v7 = vld [vmem:[#allocation2 + $0x8] sm:$0xff]   ;;  %v261_v8 = vld [vmem:[#allocation2] sm:$0xff]   ;;  %253 = vset.pattern.permute.xlu0 %v315_v11  ;;  %v157_v23 = vand.u32 127, %v156_v22  ;;  %v169_v41 = vshrl.u32 %v156_v22, 7 }
  0x11   :  { %226 = vmatprep.subr.bf16.mxu0 %v313_v0  ;;  %v33_v9 = vld [vmem:[%s357_s0] sm:$0xff]  ;;  %s316_s0 = smov [#allocation5]  }
  0x12   :  { %v34_v10 = vpack.c.bf16 %v33_v9, %v33_v9  ;;  %v206_v12 = vld [vmem:[%s359_s2] ss:$0 sm:$0xff]  ;;  %vm185_vm3 = vcmp.eq.s32.totalorder %v157_v23, 0  ;;  %vm186_vm4 = vcmp.eq.s32.totalorder %v169_v41, 0  ;;  %s197_s2 = sshll.u32 %s316_s0, 4  ;;  %s198_s2 = int_to_ptr.vmem [resolvable:$true] %s197_s2 }
  0x13   :  { %v158_v18 = vld [vmem:[%s360_s3] sm:$0xff]  ;;  %vm187_vm5 = vmand %vm185_vm3, %vm186_vm4  ;;  %s286_s27 = scalar_lea.vmem %s198_s2, 128  ;;  %p291_p6 = scmp.lt.s32.totalorder %s198_s2, %s198_s2 }
  0x14   :  { %227 = vmatpush3.bf16.msra.mxu0 %v255_v2  ;;  %p287_p5 = scmp.ne.s32.totalorder %s198_s2, %s286_s27  ;;  %p292_p7 = scmp.lt.s32.totalorder %s286_s27, %s286_s27 }
  0x15   :  { %228 = vmatprep.subr.bf16.mxu0 %v313_v0 }
  0x16   :  { %p293_p8 = por %p292_p7, %p291_p6 }
  0x18   :  { %229 = vmatpush3.bf16.msra.mxu0 %v256_v3  ;;  %p294_p9 = pnand %p293_p8, %p287_p5 }
  0x19   :  { %230 = vmatprep.subr.bf16.mxu0 %v313_v0 }
  0x1c   :  { %231 = vmatpush3.bf16.msra.mxu0 %v257_v4 }
  0x1d   :  { %232 = vmatprep.subr.bf16.mxu0 %v313_v0 }
  0x20   :  { %233 = vmatpush3.bf16.msra.mxu0 %v258_v5 }
  0x21   :  { %234 = vmatprep.subr.bf16.mxu0 %v313_v0 }
  0x24   :  { %235 = vmatpush3.bf16.msra.mxu0 %v259_v6 }
  0x25   :  { %236 = vmatprep.subr.bf16.mxu0 %v313_v0 }
  0x28   :  { %237 = vmatpush3.bf16.msra.mxu0 %v260_v7 }
  0x29   :  { %238 = vmatprep.subr.bf16.mxu0 %v313_v0 }
  0x2c   :  { %239 = vmatpush3.bf16.msra.mxu0 %v261_v8 }
  0x2f   :  { %241 = vmatmul.mubr.bf16.vlgmr.msra.gmra.mxu0 %v34_v10 }
  0xef   :  { %v140_v13 = vpop.f32.mrf.mxu0 }
  0xf0   :  { %v141_v14 = vadd.f32 %v206_v12, %v140_v13 }
  0xf1   :  { %v242_v15 = vpop.f32.mrf.mxu0 }
  0xf2   :  { %146 = vmax.xlane.f32.xlu0 %v141_v14 }
  0xf3   :  { %v143_v16 = vpop.f32.mrf.mxu0 }
  0xf5   :  { %v243_v17 = vpop.f32.mrf.mxu0 }
 0x108   :  { %160 = vperm.xlu0 %253, %v158_v18  }
 0x17b   :  { %v147_v19 = vpop.xlane.xlu0 %146 }
 0x17c   :  { %v148_v20 = vsub.f32 %v141_v14, %v147_v19 }
 0x17e   :  { %v149_v21 = vmul.f32 1.442695, %v148_v20 }
 0x180   :  { %262 = vpow2.f32 %v149_v21 }
 0x183   :  { %v161_v24 = vpop.permute.xlu0 %160 }
 0x184   :  { %vm162_vm1 = vcmp.eq.s32.totalorder %v157_v23, %v161_v24 }
 0x185   :  { %v163_v26 = vsel %vm162_vm1, %v141_v14, 0.0 }
 0x18d   :  { %v263_v25 = vpop.eup %262 }
 0x18e   :  { %151 = vadd.xlane.f32.xlu1 %v263_v25 }
 0x192   :  { %164 = vadd.xlane.f32.xlu1 %v163_v26 }
 0x217   :  { %v152_v27 = vpop.xlane.xlu1 %151 }
 0x218   :  { %264 = vlog2.f32 %v152_v27 }
 0x21b   :  { %v165_v31 = vpop.xlane.xlu1 %164 }
 0x225   :  { %v265_v28 = vpop.eup %264 }
 0x226   :  { %v154_v29 = vmul.f32 0.6931472, %v265_v28 }
 0x228   :  { %v155_v30 = vadd.f32 %v154_v29, %v147_v19 }
 0x22a   :  { %v166_v32 = vsub.f32 %v155_v30, %v165_v31 }
 0x22c   :  { %v175_v33 = vsel %vm174_vm2, %v166_v32, 0.0 }
 0x22d   :  { %176 = vadd.xlane.f32.xlu1 %v175_v33 }
 0x2b6   :  { %v177_v34 = vpop.xlane.xlu1 %176 }
 0x2b7   :  { %v178_v35 = vrot.slane %v177_v34, 4 }
 0x2b9   :  { %v179_v36 = vadd.f32 %v178_v35, %v177_v34 }
 0x2bb   :  { %v180_v37 = vrot.slane %v179_v36, 2 }
 0x2bd   :  { %v181_v38 = vadd.f32 %v180_v37, %v179_v36 }
 0x2bf   :  { %v182_v39 = vrot.slane %v181_v38, 1 }
 0x2c1   :  { %v183_v40 = vadd.f32 %v182_v39, %v181_v38 }
 0x2c3   :  { %244 = vpush %v183_v40 }
 0x2f4   :  { %s245_s3 = spop %244 }
 0x2f5   :  { %v188_v42 = vstv %s245_s3 }
 0x2f6   :  { %v189_v43 = vsel %vm187_vm5, %v188_v42, 0.0 }
 0x2f7   :  { %190 = vst [vmem:[#allocation5] sm:$0xff] %v189_v43 }
 0x2f8   :  { %297 = shalt.err (!%p294_p9)
}
 0x2f9   :  { %200 = dma.vmem_to_hbm [thread:$0]  %s198_s2, 128, %s361_s4, [#allocation4]  }
 0x2fa   :  { %308 = dma.done.wait [#allocation4], 128  }
 0x2fb   :  { %309 = vsyncadd [#allocation4], 4294967168 }
 0x2fc   :  { %204 = vsyncpa [#allocation3], 1 }
 0x2fd   :  { %205 = vsyncpa [#allocation4], 1 }

</bundles_post_ra>
